<compile_context>
chip_gen: v7x
topology: tpu7x:2x2x1
jax: 0.10.0
libtpu: 0.0.40
codegen_flags: <defaults>
</compile_context>

<pallas_src>
import functools
import math

import jax
import jax.numpy as jnp
from jax import lax
from jax.experimental import pallas as pl
from jax.experimental.pallas import tpu as pltpu

LANE = 128


def _round_up(v, m):
    return ((v + m - 1) // m) * m


def _pick_tile(n, candidates=(256, 128)):
    # 256 matches the v6e/v7x 256x256 MXU; 128 is the v5e-native fallback.
    for c in candidates:
        if n % c == 0:
            return c
    return n  # small-graph fallback: single full-extent tile


# --------------------------- kernel 1: MLP ------------------------------------

def mlp_kernel(x_ref, w1_ref, b1_ref, w2_ref, b2_ref, z0_ref):
    # x_ref: [tm, Fp]  w1: [Fp, Hp]  b1: [1, Hp]  w2: [Hp, Cp]  b2: [1, Cp]
    h = jnp.dot(x_ref[...], w1_ref[...], preferred_element_type=jnp.float32)
    h = jnp.maximum(h + b1_ref[...], 0.0)
    z0_ref[...] = (jnp.dot(h, w2_ref[...], preferred_element_type=jnp.float32)
                   + b2_ref[...])


# --------------- kernel 2: APPNP propagation + fused log_softmax --------------

def prop_kernel(z0_ref, a_ref, o_ref, z_buf, acc_ref, *,
                alpha: float, n_classes: int, tm: int, tk: int):
    # z0_ref : [N, Cp] f32 (VMEM resident)      a_ref : [tm, tk] bf16 tile of (1-a)*A_hat
    # o_ref  : [tm, Cp] f32 output tile         z_buf : [2, N, Cp] f32 ping-pong scratch
    # acc_ref: [tm, Cp] f32 row-tile accumulator
    k = pl.program_id(0)
    i = pl.program_id(1)
    j = pl.program_id(2)
    last_k = k == pl.num_programs(0) - 1
    last_j = j == pl.num_programs(2) - 1

    # One-time init: slot 0 holds z_old = z0 at k == 0.
    @pl.when((k == 0) & (i == 0) & (j == 0))
    def _():
        z_buf[0, :, :] = z0_ref[...]

    row0 = pl.multiple_of(i * tm, tm)
    col0 = pl.multiple_of(j * tk, tk)

    # Seed the accumulator with the (hoisted) teleport term alpha * z0.
    @pl.when(j == 0)
    def _():
        acc_ref[...] = alpha * z0_ref[pl.ds(row0, tm), :]

    # Partial product: ((1-alpha) * A_hat)[i_tile, j_tile] @ z_old[j_tile]
    z_old = z_buf[k % 2, pl.ds(col0, tk), :].astype(a_ref.dtype)
    acc_ref[...] += jnp.dot(a_ref[...], z_old,
                            preferred_element_type=jnp.float32)

    # Row tile finished: publish z_new into the other ping-pong slot.
    @pl.when(last_j)
    def _():
        z_new = acc_ref[...]
        z_buf[(k + 1) % 2, pl.ds(row0, tm), :] = z_new
        o_ref[...] = z_new  # overwritten by log_softmax on the last K step

    # Final K step: masked log_softmax over the first n_classes lanes.
    @pl.when(last_j & last_k)
    def _():
        z = acc_ref[...]
        col = lax.broadcasted_iota(jnp.int32, z.shape, 1)
        valid = col < n_classes
        zm = jnp.where(valid, z, -1e30)
        m = jnp.max(zm, axis=1, keepdims=True)
        e = jnp.where(valid, jnp.exp(zm - m), 0.0)
        lse = jnp.log(jnp.sum(e, axis=1, keepdims=True)) + m
        o_ref[...] = jnp.where(valid, z - lse, 0.0)


# ------------------------------ wrapper ---------------------------------------

def appnp_net_forward(x, w1, b1, w2, b2, a_hat, *, K: int, alpha: float,
                      tm=None, tk=None):
    """x: [N,F]; w1: [H,F]; b1: [H]; w2: [C,H]; b2: [C]; a_hat: [N,N] (dense)."""
    assert K >= 1
    N, F = x.shape
    H = w1.shape[0]
    C = w2.shape[0]
    Fp, Hp, Cp = _round_up(F, LANE), _round_up(H, LANE), _round_up(C, LANE)

    # Zero-padding is exact: padded input columns hit zero weight rows, padded
    # output lanes are masked in the kernel / sliced off below.
    xp = jnp.pad(x.astype(jnp.float32), ((0, 0), (0, Fp - F)))
    w1p = jnp.pad(w1.T.astype(jnp.float32), ((0, Fp - F), (0, Hp - H)))
    b1p = jnp.pad(b1.astype(jnp.float32), (0, Hp - H)).reshape(1, Hp)
    w2p = jnp.pad(w2.T.astype(jnp.float32), ((0, Hp - H), (0, Cp - C)))
    b2p = jnp.pad(b2.astype(jnp.float32), (0, Cp - C)).reshape(1, Cp)

    # Hoist the (1 - alpha) scale out of the K loop; bf16 for the only large operand.
    a_s = ((1.0 - alpha) * a_hat).astype(jnp.bfloat16)

    tm = tm or _pick_tile(N)
    tk = tk or _pick_tile(N)
    ni, nj = N // tm, N // tk

    # ---- kernel 1: z0 = relu(x @ W1 + b1) @ W2 + b2 (row tiled, parallel) ----
    z0 = pl.pallas_call(
        mlp_kernel,
        out_shape=jax.ShapeDtypeStruct((N, Cp), jnp.float32),
        grid_spec=pltpu.PrefetchScalarGridSpec(
            num_scalar_prefetch=0,
            grid=(ni,),
            in_specs=[
                pl.BlockSpec((tm, Fp), lambda i: (i, 0)),
                pl.BlockSpec((Fp, Hp), lambda i: (0, 0)),
                pl.BlockSpec((1, Hp), lambda i: (0, 0)),
                pl.BlockSpec((Hp, Cp), lambda i: (0, 0)),
                pl.BlockSpec((1, Cp), lambda i: (0, 0)),
            ],
            out_specs=pl.BlockSpec((tm, Cp), lambda i: (i, 0)),
        ),
        compiler_params=pltpu.CompilerParams(
            dimension_semantics=("parallel",)),
        cost_estimate=pl.CostEstimate(
            flops=2 * N * (Fp * Hp + Hp * Cp),
            transcendentals=0,
            bytes_accessed=4 * (N * Fp + Fp * Hp + Hp * Cp + N * Cp)),
    )(xp, w1p, b1p, w2p, b2p)

    # ---- kernel 2: K-step propagation + fused log_softmax --------------------
    vmem_need = (2 * N * Cp * 4        # z ping-pong scratch
                 + tm * Cp * 4         # accumulator scratch
                 + 2 * N * Cp * 4      # z0 input (double buffered)
                 + 2 * tm * tk * 2     # bf16 A tile (double buffered)
                 + 2 * tm * Cp * 4)    # output tile (double buffered)
    vmem_limit = int(min(max(2 * vmem_need, 32 * 1024 * 1024),
                         60 * 1024 * 1024))  # stay under v7x's 64 MiB physical

    kernel = functools.partial(prop_kernel, alpha=float(alpha),
                               n_classes=C, tm=tm, tk=tk)
    out_p = pl.pallas_call(
        kernel,
        out_shape=jax.ShapeDtypeStruct((N, Cp), jnp.float32),
        grid_spec=pltpu.PrefetchScalarGridSpec(
            num_scalar_prefetch=0,
            grid=(K, ni, nj),
            in_specs=[
                pl.BlockSpec((N, Cp), lambda k, i, j: (0, 0)),    # z0, VMEM resident
                pl.BlockSpec((tm, tk), lambda k, i, j: (i, j)),   # streamed A tiles
            ],
            out_specs=pl.BlockSpec((tm, Cp), lambda k, i, j: (i, 0)),
            scratch_shapes=[
                pltpu.VMEM((2, N, Cp), jnp.float32),   # z ping-pong
                pltpu.VMEM((tm, Cp), jnp.float32),     # row-tile accumulator
            ],
        ),
        compiler_params=pltpu.CompilerParams(
            dimension_semantics=("arbitrary", "arbitrary", "arbitrary"),
            vmem_limit_bytes=vmem_limit),
        cost_estimate=pl.CostEstimate(
            flops=2 * K * N * N * Cp,
            transcendentals=N * Cp,
            bytes_accessed=K * N * N * 2 + (K + 3) * N * Cp * 4),
    )(z0, a_s)

    return out_p[:, :C]


# ------------------------------ glue (JAX) ------------------------------------

def linear_init(key, in_features, out_features):
    """Deterministic PyTorch-style Linear init: W [out, in], b [out]."""
    kw, kb = jax.random.split(key)
    bound_w = math.sqrt(1.0 / in_features) * math.sqrt(3.0)
    w = jax.random.uniform(kw, (out_features, in_features), jnp.float32,
                           minval=-bound_w, maxval=bound_w)
    bound_b = 1.0 / math.sqrt(in_features)
    b = jax.random.uniform(kb, (out_features,), jnp.float32,
                           minval=-bound_b, maxval=bound_b)
    return w, b


def gcn_norm_dense(edge_index, num_nodes):
    """Dense A_hat = D^{-1/2} (A + I) D^{-1/2} from an edge_index [2, E]."""
    src, dst = edge_index
    a = jnp.zeros((num_nodes, num_nodes), jnp.float32).at[src, dst].set(1.0)
    a = a + jnp.eye(num_nodes, dtype=jnp.float32)
    deg = jnp.sum(a, axis=1)
    dinv = jnp.where(deg > 0, lax.rsqrt(deg), 0.0)
    return dinv[:, None] * a * dinv[None, :]


def reference_forward(x, w1, b1, w2, b2, a_hat, K, alpha, *, bf16_a):
    hp = lax.Precision.HIGHEST
    h = jnp.maximum(jnp.dot(x, w1.T, precision=hp) + b1, 0.0)
    z0 = jnp.dot(h, w2.T, precision=hp) + b2
    z = z0
    if bf16_a:
        a = ((1.0 - alpha) * a_hat).astype(jnp.bfloat16)
        for _ in range(K):
            z = jnp.dot(a, z.astype(jnp.bfloat16),
                        preferred_element_type=jnp.float32) + alpha * z0
    else:
        for _ in range(K):
            z = (1.0 - alpha) * jnp.dot(a_hat, z, precision=hp) + alpha * z0
    return jax.nn.log_softmax(z, axis=1)


if __name__ == "__main__":
    # Small but multi-tile sizes: N=512 -> propagation grid (K, 2, 2) with 256 tiles.
    N_NODES, N_FEATS, HIDDEN, N_CLASSES = 512, 64, 64, 16
    K, ALPHA = 10, 0.1
    N_EDGES = 2048

    key = jax.random.PRNGKey(0)
    kx, ke, k1, k2 = jax.random.split(key, 4)

    x = jax.random.normal(kx, (N_NODES, N_FEATS), jnp.float32)
    edge_index = jax.random.randint(ke, (2, N_EDGES), 0, N_NODES)

    w1, b1 = linear_init(k1, N_FEATS, HIDDEN)       # lin1: num_features -> hidden
    w2, b2 = linear_init(k2, HIDDEN, N_CLASSES)     # lin2: hidden -> num_classes

    a_hat = gcn_norm_dense(edge_index, N_NODES)

    out = appnp_net_forward(x, w1, b1, w2, b2, a_hat, K=K, alpha=ALPHA)
    out = jax.block_until_ready(out)
    assert out.shape == (N_NODES, N_CLASSES)

    # Check 1: same arithmetic as the kernel (bf16 A_hat, f32 accumulation) -> tight.
    ref_bf16 = reference_forward(x, w1, b1, w2, b2, a_hat, K, ALPHA, bf16_a=True)
    assert jnp.allclose(out, ref_bf16, atol=5e-3, rtol=5e-3), \
        "mismatch vs bf16-A reference"

    # Check 2: full-f32 original-module semantics -> loose sanity on bf16 A_hat.
    ref_f32 = reference_forward(x, w1, b1, w2, b2, a_hat, K, ALPHA, bf16_a=False)
    assert jnp.allclose(out, ref_f32, atol=2e-1), "mismatch vs f32 reference"

    print("KERNEL_OK")
</pallas_src>

<mosaic_0001>
module attributes {stable_mosaic.version = 11 : i64} {
  func.func @mlp_kernel(%arg0: i32, %arg1: memref<256x128xf32, #tpu.memory_space<vmem>>, %arg2: memref<128x128xf32, #tpu.memory_space<vmem>>, %arg3: memref<1x128xf32, #tpu.memory_space<vmem>>, %arg4: memref<128x128xf32, #tpu.memory_space<vmem>>, %arg5: memref<1x128xf32, #tpu.memory_space<vmem>>, %arg6: memref<256x128xf32, #tpu.memory_space<vmem>>) attributes {dimension_semantics = [#tpu.dimension_semantics<parallel>], iteration_bounds = array<i64: 2>, scalar_prefetch = 0 : i64, scratch_operands = 0 : i64, tpu.core_type = #tpu.core_type<tc>, window_params = [{transform_indices = @transform_0, window_bounds = array<i64: 256, 128>}, {pipeline_mode = #tpu.pipeline_mode<synchronous>, transform_indices = @transform_1, window_bounds = array<i64: 128, 128>}, {pipeline_mode = #tpu.pipeline_mode<synchronous>, transform_indices = @transform_2, window_bounds = array<i64: 1, 128>}, {pipeline_mode = #tpu.pipeline_mode<synchronous>, transform_indices = @transform_3, window_bounds = array<i64: 128, 128>}, {pipeline_mode = #tpu.pipeline_mode<synchronous>, transform_indices = @transform_4, window_bounds = array<i64: 1, 128>}, {transform_indices = @transform_5, window_bounds = array<i64: 256, 128>}]} {
    %c0 = arith.constant 0 : index
    %c0_0 = arith.constant 0 : index
    %0 = vector.load %arg1[%c0, %c0_0] : memref<256x128xf32, #tpu.memory_space<vmem>>, vector<256x128xf32>
    %c0_1 = arith.constant 0 : index
    %c0_2 = arith.constant 0 : index
    %1 = vector.load %arg2[%c0_1, %c0_2] : memref<128x128xf32, #tpu.memory_space<vmem>>, vector<128x128xf32>
    %cst = arith.constant dense<0.000000e+00> : vector<256x128xf32>
    %2 = tpu.matmul %0, %1, %cst {dimension_numbers = #tpu.dot_dimension_numbers<[1], [0], [0], [1], [0, 0, 1, 1], [], []>} : vector<256x128xf32>, vector<128x128xf32>, vector<256x128xf32> -> vector<256x128xf32>
    %c0_3 = arith.constant 0 : index
    %c0_4 = arith.constant 0 : index
    %3 = vector.load %arg3[%c0_3, %c0_4] : memref<1x128xf32, #tpu.memory_space<vmem>>, vector<1x128xf32>
    %4 = vector.broadcast %3 : vector<1x128xf32> to vector<256x128xf32>
    %5 = arith.addf %2, %4 : vector<256x128xf32>
    %cst_5 = arith.constant 0.000000e+00 : f32
    %6 = vector.broadcast %cst_5 : f32 to vector<256x128xf32>
    %7 = arith.maximumf %5, %6 : vector<256x128xf32>
    %c0_6 = arith.constant 0 : index
    %c0_7 = arith.constant 0 : index
    %8 = vector.load %arg4[%c0_6, %c0_7] : memref<128x128xf32, #tpu.memory_space<vmem>>, vector<128x128xf32>
    %cst_8 = arith.constant dense<0.000000e+00> : vector<256x128xf32>
    %9 = tpu.matmul %7, %8, %cst_8 {dimension_numbers = #tpu.dot_dimension_numbers<[1], [0], [0], [1], [0, 0, 1, 1], [], []>} : vector<256x128xf32>, vector<128x128xf32>, vector<256x128xf32> -> vector<256x128xf32>
    %c0_9 = arith.constant 0 : index
    %c0_10 = arith.constant 0 : index
    %10 = vector.load %arg5[%c0_9, %c0_10] : memref<1x128xf32, #tpu.memory_space<vmem>>, vector<1x128xf32>
    %11 = vector.broadcast %10 : vector<1x128xf32> to vector<256x128xf32>
    %12 = arith.addf %9, %11 : vector<256x128xf32>
    %c0_11 = arith.constant 0 : index
    %c0_12 = arith.constant 0 : index
    %13 = vector.load %arg6[%c0_11, %c0_12] : memref<256x128xf32, #tpu.memory_space<vmem>>, vector<256x128xf32>
    tpu.vector_store %arg6[%c0_11, %c0_12], %12 {strides = array<i32>} : memref<256x128xf32, #tpu.memory_space<vmem>>, vector<256x128xf32>,
    return
  }
  func.func @transform_0(%arg0: i32) -> (i32, i32) {
    %c0_i32 = arith.constant 0 : i32
    %c0_i32_0 = arith.constant 0 : i32
    return %arg0, %c0_i32 : i32, i32
  }
  func.func @transform_1(%arg0: i32) -> (i32, i32) {
    %c0_i32 = arith.constant 0 : i32
    %c0_i32_0 = arith.constant 0 : i32
    %c0_i32_1 = arith.constant 0 : i32
    return %c0_i32, %c0_i32_0 : i32, i32
  }
  func.func @transform_2(%arg0: i32) -> (i32, i32) {
    %c0_i32 = arith.constant 0 : i32
    %c0_i32_0 = arith.constant 0 : i32
    %c0_i32_1 = arith.constant 0 : i32
    return %c0_i32, %c0_i32_0 : i32, i32
  }
  func.func @transform_3(%arg0: i32) -> (i32, i32) {
    %c0_i32 = arith.constant 0 : i32
    %c0_i32_0 = arith.constant 0 : i32
    %c0_i32_1 = arith.constant 0 : i32
    return %c0_i32, %c0_i32_0 : i32, i32
  }
  func.func @transform_4(%arg0: i32) -> (i32, i32) {
    %c0_i32 = arith.constant 0 : i32
    %c0_i32_0 = arith.constant 0 : i32
    %c0_i32_1 = arith.constant 0 : i32
    return %c0_i32, %c0_i32_0 : i32, i32
  }
  func.func @transform_5(%arg0: i32) -> (i32, i32) {
    %c0_i32 = arith.constant 0 : i32
    %c0_i32_0 = arith.constant 0 : i32
    return %arg0, %c0_i32 : i32, i32
  }
}

</mosaic_0001>

<bundles_post_ra>
// kernel: tpu_custom_call.1
= control target key start
LH: loop header
LB: loop body
LE: loop exit
PB: predicated region body
PF: predicated region fallthrough
CT: control target
= control target key end

     0   :  { %10 = vsyncpa [#allocation3], 0  ;;  %s1971_s0 = inlined_call_operand.hbm [shape: f32[512,128], index: 0, kind: input, shape index: {}]   ;;  %s1972_s1 = inlined_call_operand.hbm [shape: f32[128,128], index: 1, kind: input, shape index: {}]   ;;  %s1973_s2 = inlined_call_operand.vmem [shape: f32[1,128], index: 2, kind: input, shape index: {}]   ;;  %s1974_s3 = inlined_call_operand.hbm [shape: f32[128,128], index: 3, kind: input, shape index: {}]   ;;  %s1975_s4 = inlined_call_operand.vmem [shape: f32[1,128], index: 4, kind: input, shape index: {}]   ;;  %s1976_s5 = inlined_call_operand.hbm [shape: f32[512,128], index: 5, kind: output, shape index: {}]  }
   0x1   :  { %12 = vsyncpa [#allocation3 + $0x1], 0 }
   0x2   :  { %13 = vsyncpa [#allocation6], 0 }
   0x3   :  { %14 = vsyncpa [#allocation4], 0 }
   0x4   :  { %16 = vsyncpa [#allocation4 + $0x1], 0  ;;  %s1581_s18 = smov 0   ;;  %s1583_s19 = smov 0  }
   0x5   :  { %s1585_s20 = smov 0   ;;  %s1587_s21 = smov 0  }
   0x6 LB: > { %s1602_s22 = sadd.s32 4294967295, %s1541_s21   ;;  %s972_s23 = sadd.s32 4294967294, %s1541_s21   ;;  %s1541_s21 = sphi %s1587_s21, %s1996_s21   ;;  %s1537_s20 = sphi %s1585_s20, %s1995_s20   ;;  %s1533_s19 = sphi %s1583_s19, %s1994_s19   ;;  %s1529_s18 = sphi %s1581_s18, %s1993_s18  }
   0x7   : > { %p42_p0 = scmp.ne.s32.totalorder %s1533_s19, %s1529_s18  ;;  %p1977_p1 = scmp.eq.s32.totalorder %s1602_s22, 0 }
   0x8   : > { %p156_p3 = scmp.eq.s32.totalorder %s972_s23, 1  ;;  %p973_p5 = scmp.ge.s32.totalorder %s1541_s21, 1 }
   0x9   : > { %p1611_p4 = por %p1977_p1, %p42_p0  ;;  %p163_p7 = scmp.lt.s32.totalorder %s1541_s21, 3 }
   0xa   : > { %p1616_p6 = por %p156_p3, %p42_p0  ;;  %s1543_s27 = smov [#allocation5]  }
   0xb   : > { %s1980_s24 = scalar_select %p1611_p4, 1, 0 }
   0xc   : > { %s1981_s25 = scalar_select %p1616_p6, 1, 0 }
   0xd   : > { %p1621_p8 = pnand %p973_p5, %p163_p7  ;;  %s175_s28 = sshll.u32 %s1543_s27, 4  ;;  %s1625_s28 = int_to_ptr.vmem [resolvable:$true] %s175_s28 }
   0xe   : > { %s1544_s30 = smov [#allocation7]   ;;  %s1385_s9 = scalar_lea.hbm %s1972_s1, 2048 }
   0xf   : > { %p1326_p9 = pneg %p1621_p8  ;;  %s191_s6 = sshll.u32 %s1544_s30, 4  ;;  %s1636_s6 = int_to_ptr.vmem [resolvable:$true] %s191_s6 }
  0x10   : > { %p1386_p12 = scmp.ne.s32.totalorder %s1972_s1, %s1385_s9  ;;  %p1392_p5 = scmp.lt.u32.totalorder %s1385_s9, %s1972_s1 }
  0x11   : > { %p1632_p11 = pnand %p1326_p9, %p1977_p1 }
  0x13   : > { %p1387_p13 = pneg %p1632_p11 }
  0x15   : > { %p1388_p0 = pnand %p1387_p13, %p1386_p12 }
  0x17   : > { %p1389_p3 = pneg %p1388_p0 }
  0x19   : > { %p1394_p7 = pnand %p1392_p5, %p1389_p3 }
  0x1b   : > { %1397 = shalt.err (!%p1394_p7)
}
  0x1c   : > { %s1398_s14 = scalar_lea.vmem %s1625_s28, 2048  ;;  %p1406_p2 = scmp.lt.s32.totalorder %s1625_s28, %s1625_s28 }
  0x1d   : > { %p1399_p9 = scmp.ne.s32.totalorder %s1625_s28, %s1398_s14  ;;  %p1407_p12 = scmp.lt.s32.totalorder %s1398_s14, %s1398_s14 }
  0x1f   : > { %p1401_p10 = pnand %p1399_p9, %p1387_p13  ;;  %p1408_p0 = por %p1407_p12, %p1406_p2 }
  0x21   : > { %p1402_p1 = pneg %p1401_p10 }
  0x23   : > { %p1409_p6 = pnand %p1408_p0, %p1402_p1 }
  0x25   : > { %1412 = shalt.err (!%p1409_p6)
}
  0x26   : > { %s1545_s15 = smov 128   ;;  %s1546_s16 = smov 8  }
  0x27   : > { %1329 = dma.hbm_to_vmem [thread:$0]  (!%p1632_p11), %s1972_s1, 2048, %s1625_s28, [#allocation6], %s1545_s15, %s1545_s15, %s1546_s16  }
  0x28   : > { %s1413_s7 = scalar_lea.hbm %s1974_s3, 2048 }
  0x29   : > { %p1414_p1 = scmp.ne.s32.totalorder %s1974_s3, %s1413_s7  ;;  %p1420_p10 = scmp.lt.u32.totalorder %s1413_s7, %s1974_s3 }
  0x2b   : > { %p1416_p2 = pnand %p1414_p1, %p1387_p13 }
  0x2d   : > { %p1417_p6 = pneg %p1416_p2 }
  0x2f   : > { %p1422_p3 = pnand %p1420_p10, %p1417_p6 }
  0x31   : > { %1425 = shalt.err (!%p1422_p3)
}
  0x32   : > { %s1426_s28 = scalar_lea.vmem %s1636_s6, 2048  ;;  %p1434_p12 = scmp.lt.s32.totalorder %s1636_s6, %s1636_s6 }
  0x33   : > { %p1427_p5 = scmp.ne.s32.totalorder %s1636_s6, %s1426_s28  ;;  %p1435_p0 = scmp.lt.s32.totalorder %s1426_s28, %s1426_s28 }
  0x35   : > { %p1429_p7 = pnand %p1427_p5, %p1387_p13  ;;  %p1436_p1 = por %p1435_p0, %p1434_p12 }
  0x37   : > { %p1430_p9 = pneg %p1429_p7 }
  0x39   : > { %p1437_p2 = pnand %p1436_p1, %p1430_p9 }
  0x3b   : > { %1440 = shalt.err (!%p1437_p2)
}
  0x3c   : > { %1332 = dma.hbm_to_vmem [thread:$0]  (!%p1632_p11), %s1974_s3, 2048, %s1636_s6, [#allocation6], %s1545_s15, %s1545_s15, %s1546_s16  }
  0x3d   : > { %s1697_s29 = sadd.s32 1, %s1541_s21   ;;  %s29_s14 = sadd.s32 1, %s1537_s20 }
  0x3e   : > { %s26_s17 = ssub.s32 %s1541_s21, %s1697_s29  ;;  %p36_p13 = scmp.ne.s32.totalorder %s1537_s20, %s1533_s19 }
  0x3f   : > { %p27_p6 = scmp.eq.s32.totalorder %s26_s17, 0  ;;  %p37_p10 = scmp.eq.s32.totalorder %s1541_s21, 0 }
  0x40   : > { %p1984_p3 = scmp.eq.s32.totalorder %s1602_s22, 1  ;;  %p1343_p7 = scmp.lt.s32.totalorder %s1541_s21, 2 }
  0x41   : > { %s1713_s27 = scalar_select %p27_p6, %s1537_s20, %s29_s14  }
  0x42   : > { %p1707_p5 = por %p1984_p3, %p36_p13  ;;  %p38_p9 = por %p37_p10, %p36_p13 }
  0x43   : > { %s208_s30 = sand.u32 1, %s1537_s20   ;;  %s992_s6 = sshll.u32 %s1541_s21, 12 }
  0x44   : > { %s1985_s23 = scalar_select %p1707_p5, 1, 0 }
  0x45   : > { %s977_s7 = sshll.u32 %s208_s30, 8  ;;  %s1720_s10 = scalar_lea.hbm %s1971_s0, %s992_s6 }
  0x46   : > { %s212_s11 = scalar_lea.vmem [#allocation2], %s977_s7  ;;  %p1724_p11 = pnand %p1343_p7, %p38_p9 }
  0x47   : > { %s219_s28 = sshll.u32 %s212_s11, 4  ;;  %s1728_s13 = scalar_lea.sflag [#allocation3], %s208_s30  ;;  %s1722_s28 = int_to_ptr.vmem [resolvable:$true] %s219_s28 }
  0x48   : > { %s1441_s14 = scalar_lea.hbm %s1720_s10, 4096  ;;  %p1443_p0 = pneg %p1724_p11 }
  0x49   : > { %p1442_p12 = scmp.ne.s32.totalorder %s1720_s10, %s1441_s14  ;;  %s1446_s6 = scalar_lea.hbm %s1971_s0, 8192 }
  0x4a   : > { %p1447_p13 = scmp.lt.u32.totalorder %s1720_s10, %s1971_s0  ;;  %p1448_p6 = scmp.lt.u32.totalorder %s1446_s6, %s1441_s14 }
  0x4b   : > { %p1444_p1 = pnand %p1443_p0, %p1442_p12  ;;  %p1450_p3 = scmp.lt.u32.totalorder %s1441_s14, %s1720_s10 }
  0x4c   : > { %p1449_p10 = por %p1448_p6, %p1447_p13 }
  0x4d   : > { %p1445_p2 = pneg %p1444_p1 }
  0x4e   : > { %p1451_p7 = por %p1450_p3, %p1449_p10 }
  0x50   : > { %p1452_p9 = pnand %p1451_p7, %p1445_p2 }
  0x52   : > { %1455 = shalt.err (!%p1452_p9)
}
  0x53   : > { %s1456_s30 = scalar_lea.vmem %s1722_s28, 4096  ;;  %s1547_s11 = smov [#allocation2]  }
  0x54   : > { %p1457_p12 = scmp.ne.s32.totalorder %s1722_s28, %s1456_s30  ;;  %s1461_s17 = sshll.u32 %s1547_s11, 4  ;;  %s1462_s17 = int_to_ptr.vmem [resolvable:$false] %s1461_s17 }
  0x55   : > { %s1463_s7 = scalar_lea.vmem %s1462_s17, 8192  ;;  %p1464_p4 = scmp.lt.s32.totalorder %s1722_s28, %s1462_s17 }
  0x56   : > { %p1459_p1 = pnand %p1457_p12, %p1443_p0  ;;  %p1465_p13 = scmp.lt.s32.totalorder %s1463_s7, %s1456_s30 }
  0x58   : > { %p1460_p5 = pneg %p1459_p1  ;;  %p1466_p6 = por %p1465_p13, %p1464_p4 }
  0x5a   : > { %p1467_p10 = pnand %p1466_p6, %p1460_p5 }
  0x5c   : > { %1470 = shalt.err (!%p1467_p10)
}
  0x5d   : > { %1336 = dma.hbm_to_vmem [thread:$0]  (!%p1724_p11), %s1720_s10, 4096, %s1722_s28, %s1728_s13, %s1545_s15, %s1545_s15, %s1546_s16  }
  0x5e   : > { %231 = sbr.rel (%p1621_p8) target bundleno = 648 (0x288), region = 40  ;;  %s1762_s14 = sand.u32 (!%p1621_p8), 1, %s1533_s19  }
  0x5f   : > { %s981_s6 = sshll.u32 (!%p1621_p8), %s1762_s14, 8  ;;  %s234_s8 = scalar_lea.sflag (!%p1621_p8), [#allocation3], %s1762_s14 }
  0x60   : > { %s1768_s12 = scalar_lea.vmem (!%p1621_p8), [#allocation2], %s981_s6  ;;  %p1987_p4 = scmp.ne.s32.totalorder (!%p1621_p8), %s1980_s24, 0 }
  0x65   : > { %1516 = dma.done.wait (%p1987_p4), %s234_s8, 4096  }
  0x66   : > { %1518 = vsyncadd (%p1987_p4), %s234_s8, 4294963200  ;;  %p1988_p5 = scmp.eq.s32.totalorder %s1602_s22, 0 }
  0x68   : > { %1520 = dma.done.wait (%p1988_p5), [#allocation6], 4096   ;;  %p1989_p8 = pmov %p1988_p5 }
  0x69   : > { %v306_v0 = vld [vmem:[#allocation5] sm:$0xff]  ;;  %v307_v1 = vld [vmem:[#allocation5 + $0x8] sm:$0xff]  ;;  %v308_v2 = vld [vmem:[#allocation5 + $0x10] sm:$0xff]  ;;  %s1856_s10 = scalar_lea.vmem [#allocation8], %s981_s6  ;;  %s993_s28 = sshll.u32 %s1602_s22, 12 }
  0x6a   : > { %1522 = vsyncadd (%p1989_p8), [#allocation6], 4294963200  ;;  %v1250_v3 = vpack.c.bf16 %v307_v1, %v306_v0  ;;  %v309_v4 = vld [vmem:[#allocation5 + $0x18] sm:$0xff]  ;;  %v310_v6 = vld [vmem:[#allocation5 + $0x20] sm:$0xff]  ;;  %s880_s13 = sshll.u32 %s1856_s10, 4  ;;  %s1922_s11 = scalar_lea.hbm %s1976_s5, %s993_s28  ;;  %s1924_s13 = int_to_ptr.vmem [resolvable:$true] %s880_s13 }
  0x6b   : > { %v1254_v5 = vpack.c.bf16 %v309_v4, %v308_v2  ;;  %v311_v7 = vld [vmem:[#allocation5 + $0x28] sm:$0xff]  ;;  %v274_v9 = vld [vmem:[%s1768_s12] sm:$0xff]  ;;  %v312_v10 = vld [vmem:[#allocation5 + $0x30] sm:$0xff]  ;;  %s867_s22 = scalar_lea.sflag [#allocation4], %s1762_s14  ;;  %s1471_s17 = scalar_lea.vmem %s1924_s13, 4096 }
  0x6c   : > { %1251 = vmatprep.subr.bf16.mxu0 %v1250_v3  ;;  %v1258_v8 = vpack.c.bf16 %v311_v7, %v310_v6  ;;  %v313_v11 = vld [vmem:[#allocation5 + $0x38] sm:$0xff]  ;;  %1122 = vmatprep.mubr.f32.mxu0 %v274_v9  ;;  %v314_v13 = vld [vmem:[#allocation5 + $0x40] sm:$0xff]  ;;  %v315_v14 = vld [vmem:[#allocation5 + $0x48] sm:$0xff]  ;;  %p1472_p11 = scmp.ne.s32.totalorder %s1924_s13, %s1471_s17  ;;  %p1990_p0 = scmp.ne.s32.totalorder %s1985_s23, 0 }
  0x6d   : > { %1253 = vmatpush3.bf16.msra.mxu0 %v1250_v3  ;;  %v1262_v12 = vpack.c.bf16 %v313_v11, %v312_v10  ;;  %v1266_v15 = vpack.c.bf16 %v315_v14, %v314_v13  ;;  %v316_v16 = vld [vmem:[#allocation5 + $0x50] sm:$0xff]  ;;  %v317_v17 = vld [vmem:[#allocation5 + $0x58] sm:$0xff]  ;;  %v586_v18 = vld [vmem:[#allocation7] sm:$0xff]  ;;  %s1548_s7 = smov [#allocation8]  }
  0x6e   : > { %1255 = vmatprep.subr.bf16.mxu0 %v1254_v5  ;;  %v587_v19 = vld [vmem:[#allocation7 + $0x8] sm:$0xff]  ;;  %v588_v20 = vld [vmem:[#allocation7 + $0x10] sm:$0xff]  ;;  %v1270_v21 = vpack.c.bf16 %v317_v17, %v316_v16  ;;  %v318_v22 = vld [vmem:[#allocation5 + $0x60] sm:$0xff]  ;;  %p1473_p2 = pnand %p1472_p11, %p1990_p0  ;;  %s1475_s6 = sshll.u32 %s1548_s7, 4  ;;  %s1476_s6 = int_to_ptr.vmem [resolvable:$false] %s1475_s6 }
  0x6f   : > { %v1282_v23 = vpack.c.bf16 %v587_v19, %v586_v18  ;;  %v589_v24 = vld [vmem:[#allocation7 + $0x18] sm:$0xff]  ;;  %v319_v25 = vld [vmem:[#allocation5 + $0x68] sm:$0xff]  ;;  %v590_v27 = vld [vmem:[#allocation7 + $0x20] sm:$0xff]  ;;  %s1477_s8 = scalar_lea.vmem %s1476_s6, 8192  ;;  %p1478_p7 = scmp.lt.s32.totalorder %s1924_s13, %s1476_s6 }
  0x70   : > { %v1286_v26 = vpack.c.bf16 %v589_v24, %v588_v20  ;;  %v591_v28 = vld [vmem:[#allocation7 + $0x28] sm:$0xff]  ;;  %v1274_v29 = vpack.c.bf16 %v319_v25, %v318_v22  ;;  %v320_v30 = vld [vmem:[#allocation5 + $0x70] sm:$0xff]  ;;  %v321_v32 = vld [vmem:[#allocation5 + $0x78] sm:$0xff]  ;;  %p1474_p3 = pneg %p1473_p2  ;;  %p1479_p9 = scmp.lt.s32.totalorder %s1477_s8, %s1471_s17 }
  0x71   : > { %1257 = vmatpush3.bf16.msra.mxu0 %v1254_v5  ;;  %1283 = vmatprep.subr.bf16.mxu1 %v1282_v23  ;;  %v1290_v31 = vpack.c.bf16 %v591_v28, %v590_v27  ;;  %v592_v33 = vld [vmem:[#allocation7 + $0x30] sm:$0xff]  ;;  %v593_v34 = vld [vmem:[#allocation7 + $0x38] sm:$0xff]  ;;  %v1278_v35 = vpack.c.bf16 %v321_v32, %v320_v30  ;;  %v594_v37 = vld [vmem:[#allocation7 + $0x40] sm:$0xff] }
  0x72   : > { %1259 = vmatprep.subr.bf16.mxu0 %v1258_v8  ;;  %1285 = vmatpush3.bf16.msra.mxu1 %v1282_v23  ;;  %v1294_v36 = vpack.c.bf16 %v593_v34, %v592_v33  ;;  %v595_v38 = vld [vmem:[#allocation7 + $0x48] sm:$0xff]  ;;  %v596_v40 = vld [vmem:[#allocation7 + $0x50] sm:$0xff]  ;;  %v597_v41 = vld [vmem:[#allocation7 + $0x58] sm:$0xff]  ;;  %p1480_p12 = por %p1479_p9, %p1478_p7 }
  0x73   : > { %1287 = vmatprep.subr.bf16.mxu1 %v1286_v26  ;;  %v1298_v39 = vpack.c.bf16 %v595_v38, %v594_v37  ;;  %v275_v42 = vld [vmem:[%s1768_s12 + $0x8] sm:$0xff]  ;;  %v276_v43 = vld [vmem:[%s1768_s12 + $0x10] sm:$0xff]  ;;  %v1302_v44 = vpack.c.bf16 %v597_v41, %v596_v40  ;;  %v598_v45 = vld [vmem:[#allocation7 + $0x60] sm:$0xff] }
  0x74   : > { %v599_v46 = vld [vmem:[#allocation7 + $0x68] sm:$0xff]  ;;  %v277_v47 = vld [vmem:[%s1768_s12 + $0x18] sm:$0xff]  ;;  %v278_v48 = vld [vmem:[%s1768_s12 + $0x20] sm:$0xff]  ;;  %p1481_p1 = pnand %p1480_p12, %p1474_p3 }
  0x75   : > { %1261 = vmatpush3.bf16.msra.mxu0 %v1258_v8  ;;  %v1306_v49 = vpack.c.bf16 %v599_v46, %v598_v45  ;;  %v279_v50 = vld [vmem:[%s1768_s12 + $0x28] sm:$0xff]  ;;  %v280_v51 = vld [vmem:[%s1768_s12 + $0x30] sm:$0xff]  ;;  %v281_v52 = vld [vmem:[%s1768_s12 + $0x38] sm:$0xff] }
  0x76   : > { %1263 = vmatprep.subr.bf16.mxu0 %v1262_v12  ;;  %1289 = vmatpush3.bf16.msra.mxu1 %v1286_v26  ;;  %v282_v53 = vld [vmem:[%s1768_s12 + $0x40] sm:$0xff]  ;;  %v283_v54 = vld [vmem:[%s1768_s12 + $0x48] sm:$0xff]  ;;  %v284_v55 = vld [vmem:[%s1768_s12 + $0x50] sm:$0xff] }
  0x77   : > { %1291 = vmatprep.subr.bf16.mxu1 %v1290_v31  ;;  %v285_v56 = vld [vmem:[%s1768_s12 + $0x58] sm:$0xff]  ;;  %v286_v57 = vld [vmem:[%s1768_s12 + $0x60] sm:$0xff]  ;;  %v287_v58 = vld [vmem:[%s1768_s12 + $0x68] sm:$0xff] }
  0x78   : > { %v288_v59 = vld [vmem:[%s1768_s12 + $0x70] sm:$0xff]  ;;  %v289_v60 = vld [vmem:[%s1768_s12 + $0x78] sm:$0xff]  ;;  %v290_v61 = vld [vmem:[%s1768_s12 + $0x80] sm:$0xff] }
  0x79   : > { %1265 = vmatpush3.bf16.msra.mxu0 %v1262_v12  ;;  %v291_v62 = vld [vmem:[%s1768_s12 + $0x88] sm:$0xff]  ;;  %v292_v63 = vld [vmem:[%s1768_s12 + $0x90] sm:$0xff]  ;;  %v293_v0 = vld [vmem:[%s1768_s12 + $0x98] sm:$0xff] }
  0x7a   : > { %1267 = vmatprep.subr.bf16.mxu0 %v1266_v15  ;;  %1293 = vmatpush3.bf16.msra.mxu1 %v1290_v31  ;;  %v294_v1 = vld [vmem:[%s1768_s12 + $0xa0] sm:$0xff]  ;;  %v295_v2 = vld [vmem:[%s1768_s12 + $0xa8] sm:$0xff]  ;;  %v296_v3 = vld [vmem:[%s1768_s12 + $0xb0] sm:$0xff] }
  0x7b   : > { %1295 = vmatprep.subr.bf16.mxu1 %v1294_v36  ;;  %v297_v4 = vld [vmem:[%s1768_s12 + $0xb8] sm:$0xff]  ;;  %v298_v5 = vld [vmem:[%s1768_s12 + $0xc0] sm:$0xff]  ;;  %v299_v6 = vld [vmem:[%s1768_s12 + $0xc8] sm:$0xff] }
  0x7c   : > { %v300_v7 = vld [vmem:[%s1768_s12 + $0xd0] sm:$0xff]  ;;  %v301_v8 = vld [vmem:[%s1768_s12 + $0xd8] sm:$0xff]  ;;  %v302_v9 = vld [vmem:[%s1768_s12 + $0xe0] sm:$0xff] }
  0x7d   : > { %1269 = vmatpush3.bf16.msra.mxu0 %v1266_v15  ;;  %v303_v10 = vld [vmem:[%s1768_s12 + $0xe8] sm:$0xff]  ;;  %v304_v11 = vld [vmem:[%s1768_s12 + $0xf0] sm:$0xff]  ;;  %v305_v12 = vld [vmem:[%s1768_s12 + $0xf8] sm:$0xff] }
  0x7e   : > { %1271 = vmatprep.subr.bf16.mxu0 %v1270_v21  ;;  %1297 = vmatpush3.bf16.msra.mxu1 %v1294_v36  ;;  %v600_v13 = vld [vmem:[#allocation7 + $0x70] sm:$0xff]  ;;  %v601_v14 = vld [vmem:[#allocation7 + $0x78] sm:$0xff]  ;;  %v1813_v16 = vld [vmem:[%s1973_s2] ss:$0 sm:$0xff] }
  0x7f   : > { %1299 = vmatprep.subr.bf16.mxu1 %v1298_v39  ;;  %v1310_v15 = vpack.c.bf16 %v601_v14, %v600_v13 }
  0x81   : > { %1273 = vmatpush3.bf16.msra.mxu0 %v1270_v21 }
  0x82   : > { %1275 = vmatprep.subr.bf16.mxu0 %v1274_v29  ;;  %1301 = vmatpush3.bf16.msra.mxu1 %v1298_v39 }
  0x83   : > { %1303 = vmatprep.subr.bf16.mxu1 %v1302_v44 }
  0x85   : > { %1277 = vmatpush3.bf16.msra.mxu0 %v1274_v29 }
  0x86   : > { %1279 = vmatprep.subr.bf16.mxu0 %v1278_v35  ;;  %1305 = vmatpush3.bf16.msra.mxu1 %v1302_v44 }
  0x87   : > { %1307 = vmatprep.subr.bf16.mxu1 %v1306_v49 }
  0x89   : > { %1281 = vmatpush3.bf16.msra.mxu0 %v1278_v35 }
  0x8a   : > { %1309 = vmatpush3.bf16.msra.mxu1 %v1306_v49 }
  0x8b   : > { %1311 = vmatprep.subr.bf16.mxu1 %v1310_v15 }
  0x8c   : > { %1123 = vmatmul.mubr.f32.vlgmr.msra.gmra.mrb[0].mxu0 %v275_v42 }
  0x8d   : > { %1125 = vmatprep.mubr.f32.mxu0 %v276_v43 }
  0x8e   : > { %1313 = vmatpush3.bf16.msra.mxu1 %v1310_v15 }
  0x90   : > { %1126 = vmatmul.mubr.f32.gmra.mrb[2].mxu0 %v277_v47 }
  0x91   : > { %1128 = vmatprep.mubr.f32.mxu0 %v278_v48 }
  0x94   : > { %1129 = vmatmul.mubr.f32.gmra.mrb[4].mxu0 %v279_v50 }
  0x95   : > { %1131 = vmatprep.mubr.f32.mxu0 %v280_v51 }
  0x98   : > { %1132 = vmatmul.mubr.f32.gmra.mrb[6].mxu0 %v281_v52 }
  0x99   : > { %1134 = vmatprep.mubr.f32.mxu0 %v282_v53 }
  0x9c   : > { %1135 = vmatmul.mubr.f32.gmra.mrb[8].mxu0 %v283_v54 }
  0x9d   : > { %1137 = vmatprep.mubr.f32.mxu0 %v284_v55 }
  0xa0   : > { %1138 = vmatmul.mubr.f32.gmra.mrb[10].mxu0 %v285_v56 }
  0xa1   : > { %1140 = vmatprep.mubr.f32.mxu0 %v286_v57 }
  0xa4   : > { %1141 = vmatmul.mubr.f32.gmra.mrb[12].mxu0 %v287_v58 }
  0xa5   : > { %1143 = vmatprep.mubr.f32.mxu0 %v288_v59 }
  0xa8   : > { %1144 = vmatmul.mubr.f32.gmra.mrb[14].mxu0 %v289_v60 }
  0xa9   : > { %1146 = vmatprep.mubr.f32.mxu0 %v290_v61 }
  0xac   : > { %1147 = vmatmul.mubr.f32.gmra.mrb[16].mxu0 %v291_v62 }
  0xad   : > { %1149 = vmatprep.mubr.f32.mxu0 %v292_v63 }
  0xb0   : > { %1150 = vmatmul.mubr.f32.gmra.mrb[18].mxu0 %v293_v0 }
  0xb1   : > { %1152 = vmatprep.mubr.f32.mxu0 %v294_v1 }
  0xb4   : > { %1153 = vmatmul.mubr.f32.gmra.mrb[20].mxu0 %v295_v2 }
  0xb5   : > { %1155 = vmatprep.mubr.f32.mxu0 %v296_v3 }
  0xb8   : > { %1156 = vmatmul.mubr.f32.gmra.mrb[22].mxu0 %v297_v4 }
  0xb9   : > { %1158 = vmatprep.mubr.f32.mxu0 %v298_v5 }
  0xbc   : > { %1159 = vmatmul.mubr.f32.gmra.mrb[24].mxu0 %v299_v6 }
  0xbd   : > { %1161 = vmatprep.mubr.f32.mxu0 %v300_v7 }
  0xc0   : > { %1162 = vmatmul.mubr.f32.gmra.mrb[26].mxu0 %v301_v8 }
  0xc1   : > { %1164 = vmatprep.mubr.f32.mxu0 %v302_v9 }
  0xc4   : > { %1165 = vmatmul.mubr.f32.gmra.mrb[28].mxu0 %v303_v10 }
  0xc5   : > { %1167 = vmatprep.mubr.f32.mxu0 %v304_v11 }
  0xc8   : > { %1168 = vmatmul.mubr.f32.gmra.mrb[30].mxu0 %v305_v12 }
 0x15f   : > { %v1124_v17 = vpop.f32.mrb[0].mxu0 }
 0x160   : > { %v401_v18 = vadd.f32 %v1124_v17, %v1813_v16  ;;  %v395_v19 = vpop.f32.mrb[1].mxu0 }
 0x161   : > { %v396_v20 = vadd.f32 %v1813_v16, %v395_v19 }
 0x162   : > { %v555_v23 = vmax.f32 %v401_v18, 0.0 }
 0x163   : > { %v1127_v21 = vpop.f32.mrb[2].mxu0  ;;  %v554_v22 = vmax.f32 %v396_v20, 0.0 }
 0x164   : > { %v411_v24 = vadd.f32 %v1127_v21, %v1813_v16  ;;  %v405_v25 = vpop.f32.mrb[3].mxu0 }
 0x165   : > { %v406_v26 = vadd.f32 %v1813_v16, %v405_v25  ;;  %1202 = vmatprep.mubr.f32.mxu1 %v554_v22 }
 0x166   : > { %1203 = vmatmul.mubr.f32.vlgmr.msra.gmra.mrb[0].mxu1 %v555_v23  ;;  %v557_v29 = vmax.f32 %v411_v24, 0.0 }
 0x167   : > { %v556_v27 = vmax.f32 %v406_v26, 0.0  ;;  %v1130_v28 = vpop.f32.mrb[4].mxu0 }
 0x168   : > { %v421_v30 = vadd.f32 %v1130_v28, %v1813_v16  ;;  %v415_v31 = vpop.f32.mrb[5].mxu0 }
 0x169   : > { %v416_v32 = vadd.f32 %v1813_v16, %v415_v31  ;;  %1205 = vmatprep.mubr.f32.mxu1 %v556_v27 }
 0x16a   : > { %1206 = vmatmul.mubr.f32.gmra.mrb[2].mxu1 %v557_v29  ;;  %v559_v35 = vmax.f32 %v421_v30, 0.0 }
 0x16b   : > { %v558_v33 = vmax.f32 %v416_v32, 0.0  ;;  %v1133_v34 = vpop.f32.mrb[6].mxu0 }
 0x16c   : > { %v431_v36 = vadd.f32 %v1133_v34, %v1813_v16  ;;  %v425_v37 = vpop.f32.mrb[7].mxu0 }
 0x16d   : > { %v426_v38 = vadd.f32 %v1813_v16, %v425_v37  ;;  %1208 = vmatprep.mubr.f32.mxu1 %v558_v33 }
 0x16e   : > { %1209 = vmatmul.mubr.f32.gmra.mrb[4].mxu1 %v559_v35  ;;  %v561_v41 = vmax.f32 %v431_v36, 0.0 }
 0x16f   : > { %v560_v39 = vmax.f32 %v426_v38, 0.0  ;;  %v1136_v40 = vpop.f32.mrb[8].mxu0 }
 0x170   : > { %v441_v42 = vadd.f32 %v1136_v40, %v1813_v16  ;;  %v435_v43 = vpop.f32.mrb[9].mxu0 }
 0x171   : > { %v436_v44 = vadd.f32 %v1813_v16, %v435_v43  ;;  %1211 = vmatprep.mubr.f32.mxu1 %v560_v39 }
 0x172   : > { %1212 = vmatmul.mubr.f32.gmra.mrb[6].mxu1 %v561_v41  ;;  %v563_v47 = vmax.f32 %v441_v42, 0.0 }
 0x173   : > { %v562_v45 = vmax.f32 %v436_v44, 0.0  ;;  %v1139_v46 = vpop.f32.mrb[10].mxu0 }
 0x174   : > { %v451_v48 = vadd.f32 %v1139_v46, %v1813_v16  ;;  %v445_v49 = vpop.f32.mrb[11].mxu0 }
 0x175   : > { %v446_v50 = vadd.f32 %v1813_v16, %v445_v49  ;;  %1214 = vmatprep.mubr.f32.mxu1 %v562_v45 }
 0x176   : > { %1215 = vmatmul.mubr.f32.gmra.mrb[8].mxu1 %v563_v47  ;;  %v565_v53 = vmax.f32 %v451_v48, 0.0 }
 0x177   : > { %v564_v51 = vmax.f32 %v446_v50, 0.0  ;;  %v1142_v52 = vpop.f32.mrb[12].mxu0  ;;  %v1850_v50 = vld [vmem:[%s1975_s4] ss:$0 sm:$0xff] }
 0x178   : > { %v461_v54 = vadd.f32 %v1142_v52, %v1813_v16  ;;  %v455_v55 = vpop.f32.mrb[13].mxu0 }
 0x179   : > { %v456_v56 = vadd.f32 %v1813_v16, %v455_v55  ;;  %1217 = vmatprep.mubr.f32.mxu1 %v564_v51 }
 0x17a   : > { %1218 = vmatmul.mubr.f32.gmra.mrb[10].mxu1 %v565_v53  ;;  %v567_v59 = vmax.f32 %v461_v54, 0.0 }
 0x17b   : > { %v566_v57 = vmax.f32 %v456_v56, 0.0  ;;  %v1145_v58 = vpop.f32.mrb[14].mxu0 }
 0x17c   : > { %v471_v60 = vadd.f32 %v1145_v58, %v1813_v16  ;;  %v465_v61 = vpop.f32.mrb[15].mxu0 }
 0x17d   : > { %v466_v62 = vadd.f32 %v1813_v16, %v465_v61  ;;  %1220 = vmatprep.mubr.f32.mxu1 %v566_v57 }
 0x17e   : > { %1221 = vmatmul.mubr.f32.gmra.mrb[12].mxu1 %v567_v59  ;;  %v569_v1 = vmax.f32 %v471_v60, 0.0 }
 0x17f   : > { %v568_v63 = vmax.f32 %v466_v62, 0.0  ;;  %v1148_v0 = vpop.f32.mrb[16].mxu0 }
 0x180   : > { %v481_v2 = vadd.f32 %v1148_v0, %v1813_v16  ;;  %v475_v3 = vpop.f32.mrb[17].mxu0 }
 0x181   : > { %v476_v4 = vadd.f32 %v1813_v16, %v475_v3  ;;  %1223 = vmatprep.mubr.f32.mxu1 %v568_v63 }
 0x182   : > { %1224 = vmatmul.mubr.f32.gmra.mrb[14].mxu1 %v569_v1  ;;  %v571_v7 = vmax.f32 %v481_v2, 0.0 }
 0x183   : > { %v570_v5 = vmax.f32 %v476_v4, 0.0  ;;  %v1151_v6 = vpop.f32.mrb[18].mxu0 }
 0x184   : > { %v491_v8 = vadd.f32 %v1151_v6, %v1813_v16  ;;  %v485_v9 = vpop.f32.mrb[19].mxu0 }
 0x185   : > { %v486_v10 = vadd.f32 %v1813_v16, %v485_v9  ;;  %1226 = vmatprep.mubr.f32.mxu1 %v570_v5 }
 0x186   : > { %1227 = vmatmul.mubr.f32.gmra.mrb[16].mxu1 %v571_v7  ;;  %v573_v13 = vmax.f32 %v491_v8, 0.0 }
 0x187   : > { %v572_v11 = vmax.f32 %v486_v10, 0.0  ;;  %v1154_v12 = vpop.f32.mrb[20].mxu0 }
 0x188   : > { %v501_v14 = vadd.f32 %v1154_v12, %v1813_v16  ;;  %v495_v15 = vpop.f32.mrb[21].mxu0 }
 0x189   : > { %v496_v17 = vadd.f32 %v1813_v16, %v495_v15  ;;  %1229 = vmatprep.mubr.f32.mxu1 %v572_v11 }
 0x18a   : > { %1230 = vmatmul.mubr.f32.gmra.mrb[18].mxu1 %v573_v13  ;;  %v575_v20 = vmax.f32 %v501_v14, 0.0 }
 0x18b   : > { %v574_v18 = vmax.f32 %v496_v17, 0.0  ;;  %v1157_v19 = vpop.f32.mrb[22].mxu0 }
 0x18c   : > { %v511_v21 = vadd.f32 %v1157_v19, %v1813_v16  ;;  %v505_v22 = vpop.f32.mrb[23].mxu0 }
 0x18d   : > { %v506_v23 = vadd.f32 %v1813_v16, %v505_v22  ;;  %1232 = vmatprep.mubr.f32.mxu1 %v574_v18 }
 0x18e   : > { %1233 = vmatmul.mubr.f32.gmra.mrb[20].mxu1 %v575_v20  ;;  %v577_v26 = vmax.f32 %v511_v21, 0.0 }
 0x18f   : > { %v576_v24 = vmax.f32 %v506_v23, 0.0  ;;  %v1160_v25 = vpop.f32.mrb[24].mxu0 }
 0x190   : > { %v521_v27 = vadd.f32 %v1160_v25, %v1813_v16  ;;  %v515_v28 = vpop.f32.mrb[25].mxu0 }
 0x191   : > { %v516_v29 = vadd.f32 %v1813_v16, %v515_v28  ;;  %1235 = vmatprep.mubr.f32.mxu1 %v576_v24 }
 0x192   : > { %1236 = vmatmul.mubr.f32.gmra.mrb[22].mxu1 %v577_v26  ;;  %v579_v32 = vmax.f32 %v521_v27, 0.0 }
 0x193   : > { %v578_v30 = vmax.f32 %v516_v29, 0.0  ;;  %v1163_v31 = vpop.f32.mrb[26].mxu0 }
 0x194   : > { %v531_v33 = vadd.f32 %v1163_v31, %v1813_v16  ;;  %v525_v34 = vpop.f32.mrb[27].mxu0 }
 0x195   : > { %v526_v35 = vadd.f32 %v1813_v16, %v525_v34  ;;  %1238 = vmatprep.mubr.f32.mxu1 %v578_v30 }
 0x196   : > { %1239 = vmatmul.mubr.f32.gmra.mrb[24].mxu1 %v579_v32  ;;  %v581_v38 = vmax.f32 %v531_v33, 0.0 }
 0x197   : > { %v580_v36 = vmax.f32 %v526_v35, 0.0  ;;  %v1166_v37 = vpop.f32.mrb[28].mxu0 }
 0x198   : > { %v541_v39 = vadd.f32 %v1166_v37, %v1813_v16  ;;  %v535_v40 = vpop.f32.mrb[29].mxu0 }
 0x199   : > { %v536_v41 = vadd.f32 %v1813_v16, %v535_v40  ;;  %1241 = vmatprep.mubr.f32.mxu1 %v580_v36 }
 0x19a   : > { %1242 = vmatmul.mubr.f32.gmra.mrb[26].mxu1 %v581_v38  ;;  %v583_v44 = vmax.f32 %v541_v39, 0.0 }
 0x19b   : > { %v582_v42 = vmax.f32 %v536_v41, 0.0  ;;  %v1169_v43 = vpop.f32.mrb[30].mxu0 }
 0x19c   : > { %v551_v45 = vadd.f32 %v1169_v43, %v1813_v16  ;;  %v545_v46 = vpop.f32.mrb[31].mxu0 }
 0x19d   : > { %v546_v47 = vadd.f32 %v1813_v16, %v545_v46  ;;  %1244 = vmatprep.mubr.f32.mxu1 %v582_v42 }
 0x19e   : > { %1245 = vmatmul.mubr.f32.gmra.mrb[28].mxu1 %v583_v44  ;;  %v585_v49 = vmax.f32 %v551_v45, 0.0 }
 0x19f   : > { %v584_v48 = vmax.f32 %v546_v47, 0.0 }
 0x1a1   : > { %1247 = vmatprep.mubr.f32.mxu1 %v584_v48 }
 0x1a2   : > { %1248 = vmatmul.mubr.f32.gmra.mrb[30].mxu1 %v585_v49 }
 0x239   : > { %v1204_v51 = vpop.f32.mrb[0].mxu1 }
 0x23a   : > { %v681_v52 = vadd.f32 %v1204_v51, %v1850_v50  ;;  %v675_v53 = vpop.f32.mrb[1].mxu1 }
 0x23b   : > { %v676_v54 = vadd.f32 %v1850_v50, %v675_v53 }
 0x23c   : > { %835 = vst [vmem:[%s1856_s10 + $0x8] sm:$0xff] %v681_v52 }
 0x23d   : > { %834 = vst [vmem:[%s1856_s10] sm:$0xff] %v676_v54  ;;  %v1207_v16 = vpop.f32.mrb[2].mxu1 }
 0x23e   : > { %v691_v55 = vadd.f32 %v1207_v16, %v1850_v50  ;;  %v685_v56 = vpop.f32.mrb[3].mxu1 }
 0x23f   : > { %v686_v57 = vadd.f32 %v1850_v50, %v685_v56 }
 0x240   : > { %837 = vst [vmem:[%s1856_s10 + $0x18] sm:$0xff] %v691_v55 }
 0x241   : > { %836 = vst [vmem:[%s1856_s10 + $0x10] sm:$0xff] %v686_v57  ;;  %v1210_v58 = vpop.f32.mrb[4].mxu1 }
 0x242   : > { %v701_v59 = vadd.f32 %v1210_v58, %v1850_v50  ;;  %v695_v60 = vpop.f32.mrb[5].mxu1 }
 0x243   : > { %v696_v61 = vadd.f32 %v1850_v50, %v695_v60 }
 0x244   : > { %839 = vst [vmem:[%s1856_s10 + $0x28] sm:$0xff] %v701_v59 }
 0x245   : > { %838 = vst [vmem:[%s1856_s10 + $0x20] sm:$0xff] %v696_v61  ;;  %v1213_v62 = vpop.f32.mrb[6].mxu1 }
 0x246   : > { %v711_v63 = vadd.f32 %v1213_v62, %v1850_v50  ;;  %v705_v0 = vpop.f32.mrb[7].mxu1 }
 0x247   : > { %v706_v1 = vadd.f32 %v1850_v50, %v705_v0 }
 0x248   : > { %841 = vst [vmem:[%s1856_s10 + $0x38] sm:$0xff] %v711_v63 }
 0x249   : > { %840 = vst [vmem:[%s1856_s10 + $0x30] sm:$0xff] %v706_v1  ;;  %v1216_v2 = vpop.f32.mrb[8].mxu1 }
 0x24a   : > { %v721_v3 = vadd.f32 %v1216_v2, %v1850_v50  ;;  %v715_v4 = vpop.f32.mrb[9].mxu1 }
 0x24b   : > { %v716_v5 = vadd.f32 %v1850_v50, %v715_v4 }
 0x24c   : > { %843 = vst [vmem:[%s1856_s10 + $0x48] sm:$0xff] %v721_v3 }
 0x24d   : > { %842 = vst [vmem:[%s1856_s10 + $0x40] sm:$0xff] %v716_v5  ;;  %v1219_v6 = vpop.f32.mrb[10].mxu1 }
 0x24e   : > { %v731_v7 = vadd.f32 %v1219_v6, %v1850_v50  ;;  %v725_v8 = vpop.f32.mrb[11].mxu1 }
 0x24f   : > { %v726_v9 = vadd.f32 %v1850_v50, %v725_v8 }
 0x250   : > { %845 = vst [vmem:[%s1856_s10 + $0x58] sm:$0xff] %v731_v7 }
 0x251   : > { %844 = vst [vmem:[%s1856_s10 + $0x50] sm:$0xff] %v726_v9  ;;  %v1222_v10 = vpop.f32.mrb[12].mxu1 }
 0x252   : > { %v741_v11 = vadd.f32 %v1222_v10, %v1850_v50  ;;  %v735_v12 = vpop.f32.mrb[13].mxu1 }
 0x253   : > { %v736_v13 = vadd.f32 %v1850_v50, %v735_v12 }
 0x254   : > { %847 = vst [vmem:[%s1856_s10 + $0x68] sm:$0xff] %v741_v11 }
 0x255   : > { %846 = vst [vmem:[%s1856_s10 + $0x60] sm:$0xff] %v736_v13  ;;  %v1225_v14 = vpop.f32.mrb[14].mxu1 }
 0x256   : > { %v751_v15 = vadd.f32 %v1225_v14, %v1850_v50  ;;  %v745_v17 = vpop.f32.mrb[15].mxu1 }
 0x257   : > { %v746_v18 = vadd.f32 %v1850_v50, %v745_v17 }
 0x258   : > { %849 = vst [vmem:[%s1856_s10 + $0x78] sm:$0xff] %v751_v15 }
 0x259   : > { %848 = vst [vmem:[%s1856_s10 + $0x70] sm:$0xff] %v746_v18  ;;  %v1228_v19 = vpop.f32.mrb[16].mxu1 }
 0x25a   : > { %v761_v20 = vadd.f32 %v1228_v19, %v1850_v50  ;;  %v755_v21 = vpop.f32.mrb[17].mxu1 }
 0x25b   : > { %v756_v22 = vadd.f32 %v1850_v50, %v755_v21 }
 0x25c   : > { %851 = vst [vmem:[%s1856_s10 + $0x88] sm:$0xff] %v761_v20 }
 0x25d   : > { %850 = vst [vmem:[%s1856_s10 + $0x80] sm:$0xff] %v756_v22  ;;  %v1231_v23 = vpop.f32.mrb[18].mxu1 }
 0x25e   : > { %v771_v24 = vadd.f32 %v1231_v23, %v1850_v50  ;;  %v765_v25 = vpop.f32.mrb[19].mxu1 }
 0x25f   : > { %v766_v26 = vadd.f32 %v1850_v50, %v765_v25 }
 0x260   : > { %853 = vst [vmem:[%s1856_s10 + $0x98] sm:$0xff] %v771_v24 }
 0x261   : > { %852 = vst [vmem:[%s1856_s10 + $0x90] sm:$0xff] %v766_v26  ;;  %v1234_v27 = vpop.f32.mrb[20].mxu1 }
 0x262   : > { %v781_v28 = vadd.f32 %v1234_v27, %v1850_v50  ;;  %v775_v29 = vpop.f32.mrb[21].mxu1 }
 0x263   : > { %v776_v30 = vadd.f32 %v1850_v50, %v775_v29 }
 0x264   : > { %855 = vst [vmem:[%s1856_s10 + $0xa8] sm:$0xff] %v781_v28 }
 0x265   : > { %854 = vst [vmem:[%s1856_s10 + $0xa0] sm:$0xff] %v776_v30  ;;  %v1237_v31 = vpop.f32.mrb[22].mxu1 }
 0x266   : > { %v791_v32 = vadd.f32 %v1237_v31, %v1850_v50  ;;  %v785_v33 = vpop.f32.mrb[23].mxu1 }
 0x267   : > { %v786_v34 = vadd.f32 %v1850_v50, %v785_v33 }
 0x268   : > { %857 = vst [vmem:[%s1856_s10 + $0xb8] sm:$0xff] %v791_v32 }
 0x269   : > { %856 = vst [vmem:[%s1856_s10 + $0xb0] sm:$0xff] %v786_v34  ;;  %v1240_v35 = vpop.f32.mrb[24].mxu1 }
 0x26a   : > { %v801_v36 = vadd.f32 %v1240_v35, %v1850_v50  ;;  %v795_v37 = vpop.f32.mrb[25].mxu1 }
 0x26b   : > { %v796_v38 = vadd.f32 %v1850_v50, %v795_v37 }
 0x26c   : > { %859 = vst [vmem:[%s1856_s10 + $0xc8] sm:$0xff] %v801_v36 }
 0x26d   : > { %858 = vst [vmem:[%s1856_s10 + $0xc0] sm:$0xff] %v796_v38  ;;  %v1243_v39 = vpop.f32.mrb[26].mxu1 }
 0x26e   : > { %v811_v40 = vadd.f32 %v1243_v39, %v1850_v50  ;;  %v805_v41 = vpop.f32.mrb[27].mxu1 }
 0x26f   : > { %v806_v42 = vadd.f32 %v1850_v50, %v805_v41 }
 0x270   : > { %861 = vst [vmem:[%s1856_s10 + $0xd8] sm:$0xff] %v811_v40 }
 0x271   : > { %860 = vst [vmem:[%s1856_s10 + $0xd0] sm:$0xff] %v806_v42  ;;  %v1246_v43 = vpop.f32.mrb[28].mxu1 }
 0x272   : > { %v821_v44 = vadd.f32 %v1246_v43, %v1850_v50  ;;  %v815_v45 = vpop.f32.mrb[29].mxu1 }
 0x273   : > { %v816_v46 = vadd.f32 %v1850_v50, %v815_v45 }
 0x274   : > { %863 = vst [vmem:[%s1856_s10 + $0xe8] sm:$0xff] %v821_v44 }
 0x275   : > { %862 = vst [vmem:[%s1856_s10 + $0xe0] sm:$0xff] %v816_v46  ;;  %v1249_v47 = vpop.f32.mrb[30].mxu1 }
 0x276   : > { %v831_v48 = vadd.f32 %v1249_v47, %v1850_v50  ;;  %v825_v49 = vpop.f32.mrb[31].mxu1 }
 0x277   : > { %v826_v51 = vadd.f32 %v1850_v50, %v825_v49 }
 0x278   : > { %865 = vst [vmem:[%s1856_s10 + $0xf8] sm:$0xff] %v831_v48 }
 0x279   : > { %864 = vst [vmem:[%s1856_s10 + $0xf0] sm:$0xff] %v826_v51 }
 0x27a   : > { %1484 = shalt.err (!%p1481_p1)
}
 0x27b   : > { %s1485_s12 = scalar_lea.hbm %s1922_s11, 4096  ;;  %s1489_s15 = scalar_lea.hbm %s1976_s5, 8192 }
 0x27c   : > { %p1486_p13 = scmp.ne.s32.totalorder %s1922_s11, %s1485_s12  ;;  %p1490_p4 = scmp.lt.u32.totalorder %s1922_s11, %s1976_s5 }
 0x27d   : > { %p1491_p5 = scmp.lt.u32.totalorder %s1489_s15, %s1485_s12  ;;  %p1493_p11 = scmp.lt.u32.totalorder %s1485_s12, %s1922_s11 }
 0x27e   : > { %p1487_p6 = pnand %p1486_p13, %p1990_p0 }
 0x27f   : > { %p1492_p8 = por %p1491_p5, %p1490_p4 }
 0x280   : > { %p1488_p10 = pneg %p1487_p6 }
 0x281   : > { %p1494_p2 = por %p1493_p11, %p1492_p8 }
 0x283   : > { %p1495_p3 = pnand %p1494_p2, %p1488_p10 }
 0x285   : > { %1498 = shalt.err (!%p1495_p3)
}
 0x286   : > { %s1549_s28 = smov 128   ;;  %s1550_s9 = smov 8  }
 0x287   : > { %1324 = dma.vmem_to_hbm [thread:$0]  (%p1990_p0), %s1924_s13, 4096, %s1922_s11, %s867_s22, %s1549_s28, %s1549_s28, %s1550_s9  }
 0x288 PF: > { %s895_s30 = sand.u32 1, %s1529_s18   ;;  %p1991_p7 = scmp.ne.s32.totalorder %s1981_s25, 0 }
 0x289   : > { %p1992_p9 = scmp.ge.s32.totalorder %s1541_s21, 2  ;;  %s896_s17 = scalar_lea.sflag [#allocation4], %s895_s30 }
 0x28b   : > { %p1338_p12 = pnand %p1992_p9, %p1991_p7 }
 0x28d   : > { %1524 = dma.done.wait (!%p1338_p12), %s896_s17, 4096  }
 0x28e   : > { %1526 = vsyncadd (!%p1338_p12), %s896_s17, 4294963200  ;;  %p19_p1 = scmp.ge.s32.totalorder %s1697_s29, 4   ;;  %s1993_s18 = smov %s1533_s19 }
 0x28f   : > { %s1994_s19 = smov %s1537_s20  ;;  %s1995_s20 = smov %s1713_s27 }
 0x290   : > { %s1996_s21 = smov %s1697_s29  ;;  %21 = sbr.rel (!%p19_p1) target bundleno = 6 (0x6), region = 93 }
 0x297   :  { %901 = vsyncpa [#allocation3], 1 }
 0x298   :  { %903 = vsyncpa [#allocation3 + $0x1], 1 }
 0x299   :  { %904 = vsyncpa [#allocation6], 1 }
 0x29a   :  { %905 = vsyncpa [#allocation4], 1 }
 0x29b   :  { %907 = vsyncpa [#allocation4 + $0x1], 1 }

</bundles_post_ra>
